<compile_context>
chip_gen: v5e
topology: v5e:2x2
jax: 0.10.0
libtpu: 0.0.40
codegen_flags: <defaults>
</compile_context>

<pallas_src>
import functools

import jax
import jax.numpy as jnp
from jax.experimental import pallas as pl
from jax.experimental.pallas import tpu as pltpu

LANE = 128        # lane width (last dim of every block)
TM_MIN = 512      # don't shrink blocks below this (per-step overhead)
TM_MAX = 8192     # 4 MiB f32 blocks; vmem_limit_bytes below is sized for this
MIN_BLOCKS = 4    # aim for >= 4 grid steps on mid-size inputs
VMEM_LIMIT = 40 * 1024 * 1024   # fits worst case (~24 MiB) on every generation


def _focal_elementwise(x, t, alpha, gamma):
    """Elementwise sigmoid focal loss in f32 (matches the torch module)."""
    e = jnp.exp(-jnp.abs(x))                      # single EUP exp, reused below
    # numerically stable BCE-with-logits, reduction='none'
    ce = jnp.maximum(x, 0.0) - x * t + jnp.log1p(e)
    # sigmoid derived from the same exp (exact divide; approx flagged as risky)
    inv = 1.0 / (1.0 + e)
    p = jnp.where(x >= 0.0, inv, e * inv)
    # 1 - p_t with p_t = p*t + (1-p)*(1-t) folds to p + t - 2*p*t
    one_minus_pt = p + t - 2.0 * (p * t)
    g = float(gamma)
    if g == int(g) and 0 <= int(g) <= 4:
        # small integer gamma: repeated multiply instead of pow (no exp/log)
        w = jnp.ones_like(one_minus_pt)
        for _ in range(int(g)):
            w = w * one_minus_pt
        loss = ce * w
    else:
        loss = ce * jnp.power(one_minus_pt, g)
    if alpha > 0:  # same gate as the reference nn.Module (`if self.alpha > 0`)
        c0 = 1.0 - alpha
        c1 = 2.0 * alpha - 1.0
        loss = (c0 + c1 * t) * loss              # alpha_t folded to affine form
    return loss


def _focal_reduce_kernel(x_ref, t_ref, out_ref, acc_ref, *, alpha, gamma,
                         valid_rows, exact):
    """Per-parallel-slice partial sum of the focal loss into an (8,128) acc."""
    p = pl.program_id(0)
    s = pl.program_id(1)

    @pl.when(s == 0)
    def _init():
        acc_ref[...] = jnp.zeros_like(acc_ref)

    tm = x_ref.shape[0]
    acc_rows = acc_ref.shape[0]

    x = x_ref[...].astype(jnp.float32)
    t = t_ref[...].astype(jnp.float32)
    loss = _focal_elementwise(x, t, alpha, gamma)

    def fold(v):
        # (tm, 128) -> (acc_rows, 128); tile-aligned reshape, leading-axis sum.
        if acc_rows == 8 and tm % 8 == 0:
            return v.reshape(tm // 8, 8, LANE).sum(axis=0)
        return v  # acc_rows == tm (small single-block case)

    if exact:
        # All blocks are full and every grid step maps to a distinct block.
        acc_ref[...] += fold(loss)
    else:
        # Logical (unclamped) starting row of this grid step.
        row0 = (p * pl.num_programs(1) + s) * tm
        is_full = row0 + tm <= valid_rows

        @pl.when(is_full)
        def _acc_full():
            acc_ref[...] += fold(loss)

        @pl.when(jnp.logical_and(jnp.logical_not(is_full), row0 < valid_rows))
        def _acc_boundary():
            # Row-level select (not multiply) so garbage OOB rows (possibly
            # NaN/Inf) never leak into the accumulator.
            row = row0 + jax.lax.broadcasted_iota(jnp.int32, loss.shape, 0)
            acc_ref[...] += fold(jnp.where(row < valid_rows, loss, 0.0))
        # Overrun steps (row0 >= valid_rows) skip accumulation entirely; their
        # index_map clamps to the previous step's block so no DMA is re-issued.

    @pl.when(s == pl.num_programs(1) - 1)
    def _emit():
        out_ref[...] = acc_ref[...]


def _focal_elem_kernel(x_ref, t_ref, out_ref, *, alpha, gamma):
    """Pure elementwise focal loss (reduction='none')."""
    x = x_ref[...].astype(jnp.float32)
    t = t_ref[...].astype(jnp.float32)
    out_ref[...] = _focal_elementwise(x, t, alpha, gamma).astype(out_ref.dtype)


def _cdiv(a, b):
    return -(-a // b)


def _round_up(a, m):
    return _cdiv(a, m) * m


def _choose_tm(R):
    """Block row count: big enough to amortize per-step overhead, small enough
    that mid-size inputs still get >= MIN_BLOCKS grid steps."""
    if R <= TM_MIN:
        return R                                   # single full-dim block
    return min(TM_MAX, max(TM_MIN, _round_up(_cdiv(R, MIN_BLOCKS), 8)))


def sigmoid_focal_loss(inputs, targets, alpha=0.25, gamma=2.0, reduction="mean"):
    if reduction not in ("none", "mean", "sum"):
        raise ValueError(f"Invalid reduction: {reduction}")
    assert inputs.shape == targets.shape
    orig_shape = inputs.shape
    total = inputs.size
    x_flat = inputs.reshape(-1)
    t_flat = targets.reshape(-1)

    R = total // LANE           # full lane-rows
    aligned = R * LANE
    tail = total - aligned      # < 128 ragged elements, handled in the wrapper

    if R == 0:
        # Fewer than 128 elements: pure-jnp fallback, not worth a kernel.
        loss = _focal_elementwise(x_flat.astype(jnp.float32),
                                  t_flat.astype(jnp.float32), alpha, gamma)
        if reduction == "none":
            return loss.astype(inputs.dtype).reshape(orig_shape)
        out = jnp.sum(loss)
        if reduction == "mean":
            out = out / total
        return out.astype(inputs.dtype)

    tail_loss = None
    if tail:
        tail_loss = _focal_elementwise(x_flat[aligned:].astype(jnp.float32),
                                       t_flat[aligned:].astype(jnp.float32),
                                       alpha, gamma)

    # Lane-dense (R, 128) slab of the aligned prefix.  When total % 128 == 0
    # this is a free reshape (no copies, no padding).
    x2 = (x_flat if tail == 0 else x_flat[:aligned]).reshape(R, LANE)
    t2 = (t_flat if tail == 0 else t_flat[:aligned]).reshape(R, LANE)

    tm = _choose_tm(R)
    n_blocks = _cdiv(R, tm)

    if reduction in ("mean", "sum"):
        # Split blocks into P parallel slices so both TensorCores are used on
        # v7x (harmless on single-TC chips).
        P = 2 if n_blocks >= 2 else 1
        S = _cdiv(n_blocks, P)
        acc_rows = 8 if (tm % 8 == 0 and tm >= 8) else tm
        exact = (R % tm == 0) and (P * S == n_blocks)

        def in_map(p, s):
            # Clamp overrun steps to the last block: same index as the previous
            # step of that slice => the pipeliner skips the redundant DMA; the
            # kernel skips its accumulation via pl.when.
            return (jnp.minimum(p * S + s, n_blocks - 1), 0)

        kernel = functools.partial(_focal_reduce_kernel, alpha=alpha,
                                   gamma=gamma, valid_rows=R, exact=exact)
        partials = pl.pallas_call(
            kernel,
            out_shape=jax.ShapeDtypeStruct((P, acc_rows, LANE), jnp.float32),
            grid_spec=pltpu.PrefetchScalarGridSpec(
                num_scalar_prefetch=0,
                grid=(P, S),
                in_specs=[
                    pl.BlockSpec((tm, LANE), in_map),
                    pl.BlockSpec((tm, LANE), in_map),
                ],
                out_specs=pl.BlockSpec((None, acc_rows, LANE),
                                       lambda p, s: (p, 0, 0)),
                scratch_shapes=[pltpu.VMEM((acc_rows, LANE), jnp.float32)],
            ),
            compiler_params=pltpu.CompilerParams(
                dimension_semantics=("parallel", "arbitrary"),
                vmem_limit_bytes=VMEM_LIMIT),
        )(x2, t2)

        total_sum = jnp.sum(partials)
        if tail:
            total_sum = total_sum + jnp.sum(tail_loss)
        if reduction == "mean":
            total_sum = total_sum / total
        return total_sum.astype(inputs.dtype)

    # reduction == 'none'
    kernel = functools.partial(_focal_elem_kernel, alpha=alpha, gamma=gamma)
    out = pl.pallas_call(
        kernel,
        out_shape=jax.ShapeDtypeStruct((R, LANE), inputs.dtype),
        grid_spec=pltpu.PrefetchScalarGridSpec(
            num_scalar_prefetch=0,
            grid=(n_blocks,),
            in_specs=[
                pl.BlockSpec((tm, LANE), lambda i: (i, 0)),
                pl.BlockSpec((tm, LANE), lambda i: (i, 0)),
            ],
            out_specs=pl.BlockSpec((tm, LANE), lambda i: (i, 0)),
        ),
        compiler_params=pltpu.CompilerParams(
            dimension_semantics=("parallel",),
            vmem_limit_bytes=VMEM_LIMIT),
    )(x2, t2)
    main = out.reshape(-1)
    if tail:
        main = jnp.concatenate([main, tail_loss.astype(inputs.dtype)])
    return main.reshape(orig_shape)


def _reference(inputs, targets, alpha=0.25, gamma=2.0, reduction="mean"):
    x = inputs.astype(jnp.float32)
    t = targets.astype(jnp.float32)
    p = jax.nn.sigmoid(x)
    ce = jnp.maximum(x, 0.0) - x * t + jnp.log1p(jnp.exp(-jnp.abs(x)))
    p_t = p * t + (1.0 - p) * (1.0 - t)
    loss = ce * (1.0 - p_t) ** gamma
    if alpha > 0:
        loss = (alpha * t + (1.0 - alpha) * (1.0 - t)) * loss
    if reduction == "mean":
        return loss.mean()
    if reduction == "sum":
        return loss.sum()
    return loss


if __name__ == "__main__":
    key = jax.random.PRNGKey(0)
    k = jax.random.split(key, 6)

    # small detection-style shape: (N, C, H, W) logits + 0/1 targets
    x_s = jax.random.normal(k[0], (2, 4, 16, 16), dtype=jnp.float32)
    t_s = (jax.random.uniform(k[1], (2, 4, 16, 16)) > 0.5).astype(jnp.float32)
    for red in ("mean", "sum", "none"):
        out = jax.block_until_ready(sigmoid_focal_loss(x_s, t_s, reduction=red))
        ref = _reference(x_s, t_s, reduction=red)
        assert jnp.allclose(out, ref, rtol=1e-4, atol=1e-5), (red, out, ref)

    # ragged total (exercises the <128-element tail path: no pad, no copies
    # beyond the tiny tail handling)
    x_r = jax.random.normal(k[2], (3, 5, 7, 11), dtype=jnp.float32)
    t_r = (jax.random.uniform(k[3], (3, 5, 7, 11)) > 0.5).astype(jnp.float32)
    for red in ("mean", "none"):
        out = jax.block_until_ready(sigmoid_focal_loss(x_r, t_r, reduction=red))
        ref = _reference(x_r, t_r, reduction=red)
        assert jnp.allclose(out, ref, rtol=1e-4, atol=1e-5), (red, out, ref)

    # medium shape: multi-block grid, 2-way parallel split, a partial boundary
    # block and a skipped overrun step (R=1300 rows, tm=512 -> 3 blocks).
    x_m = jax.random.normal(k[4], (2, 4, 160, 130), dtype=jnp.float32)
    t_m = (jax.random.uniform(k[5], (2, 4, 160, 130)) > 0.5).astype(jnp.float32)
    for red in ("mean", "sum", "none"):
        out = jax.block_until_ready(sigmoid_focal_loss(x_m, t_m, reduction=red))
        ref = _reference(x_m, t_m, reduction=red)
        assert jnp.allclose(out, ref, rtol=1e-4, atol=1e-5), (red, out, ref)

    print("KERNEL_OK")
</pallas_src>

<mosaic_0001>
module attributes {stable_mosaic.version = 11 : i64} {
  func.func @_focal_reduce_kernel(%arg0: i32, %arg1: i32, %arg2: memref<16x128xf32, #tpu.memory_space<vmem>>, %arg3: memref<16x128xf32, #tpu.memory_space<vmem>>, %arg4: memref<1x8x128xf32, #tpu.memory_space<vmem>>, %arg5: memref<8x128xf32, #tpu.memory_space<vmem>>) attributes {dimension_semantics = [#tpu.dimension_semantics<parallel>, #tpu.dimension_semantics<arbitrary>], iteration_bounds = array<i64: 1, 1>, scalar_prefetch = 0 : i64, scratch_operands = 1 : i64, tpu.core_type = #tpu.core_type<tc>, window_params = [{transform_indices = @transform_0, window_bounds = array<i64: 16, 128>}, {transform_indices = @transform_1, window_bounds = array<i64: 16, 128>}, {transform_indices = @transform_2, window_bounds = array<i64: 1, 8, 128>}]} {
    %c0_i32 = arith.constant 0 : i32
    %0 = arith.cmpi eq, %arg1, %c0_i32 : i32
    %1 = arith.extui %0 : i1 to i32
    %c0_i32_0 = arith.constant 0 : i32
    %2 = arith.cmpi ne, %1, %c0_i32_0 : i32
    scf.if %2 {
      %cst_19 = arith.constant 0.000000e+00 : f32
      %45 = vector.broadcast %cst_19 : f32 to vector<8x128xf32>
      %c0_20 = arith.constant 0 : index
      %c0_21 = arith.constant 0 : index
      %46 = vector.load %arg5[%c0_20, %c0_21] : memref<8x128xf32, #tpu.memory_space<vmem>>, vector<8x128xf32>
      tpu.vector_store %arg5[%c0_20, %c0_21], %45 {strides = array<i32>} : memref<8x128xf32, #tpu.memory_space<vmem>>, vector<8x128xf32>,
    } else {
    }
    %c0 = arith.constant 0 : index
    %c0_1 = arith.constant 0 : index
    %3 = vector.load %arg2[%c0, %c0_1] : memref<16x128xf32, #tpu.memory_space<vmem>>, vector<16x128xf32>
    %c0_2 = arith.constant 0 : index
    %c0_3 = arith.constant 0 : index
    %4 = vector.load %arg3[%c0_2, %c0_3] : memref<16x128xf32, #tpu.memory_space<vmem>>, vector<16x128xf32>
    %5 = math.absf %3 : vector<16x128xf32>
    %cst = arith.constant 0.000000e+00 : f32
    %6 = vector.broadcast %cst : f32 to vector<16x128xf32>
    %7 = arith.subf %6, %5 : vector<16x128xf32>
    %8 = math.exp %7 : vector<16x128xf32>
    %cst_4 = arith.constant 0.000000e+00 : f32
    %9 = vector.broadcast %cst_4 : f32 to vector<16x128xf32>
    %10 = arith.maximumf %3, %9 : vector<16x128xf32>
    %11 = arith.mulf %3, %4 : vector<16x128xf32>
    %12 = arith.subf %10, %11 : vector<16x128xf32>
    %13 = math.log1p %8 : vector<16x128xf32>
    %14 = arith.addf %12, %13 : vector<16x128xf32>
    %cst_5 = arith.constant 1.000000e+00 : f32
    %15 = vector.broadcast %cst_5 : f32 to vector<16x128xf32>
    %16 = arith.addf %15, %8 : vector<16x128xf32>
    %cst_6 = arith.constant 1.000000e+00 : f32
    %17 = vector.broadcast %cst_6 : f32 to vector<16x128xf32>
    %18 = arith.divf %17, %16 : vector<16x128xf32>
    %cst_7 = arith.constant 0.000000e+00 : f32
    %19 = vector.broadcast %cst_7 : f32 to vector<16x128xf32>
    %20 = arith.cmpf oge, %3, %19 : vector<16x128xf32>
    %21 = arith.mulf %8, %18 : vector<16x128xf32>
    %22 = arith.select %20, %18, %21 : vector<16x128xi1>, vector<16x128xf32>
    %23 = arith.addf %22, %4 : vector<16x128xf32>
    %24 = arith.mulf %22, %4 : vector<16x128xf32>
    %cst_8 = arith.constant 2.000000e+00 : f32
    %25 = vector.broadcast %cst_8 : f32 to vector<16x128xf32>
    %26 = arith.mulf %25, %24 : vector<16x128xf32>
    %27 = arith.subf %23, %26 : vector<16x128xf32>
    %cst_9 = arith.constant 1.000000e+00 : f32
    %28 = vector.broadcast %cst_9 : f32 to vector<16x128xf32>
    %29 = arith.mulf %28, %27 : vector<16x128xf32>
    %30 = arith.mulf %29, %27 : vector<16x128xf32>
    %31 = arith.mulf %14, %30 : vector<16x128xf32>
    %cst_10 = arith.constant -5.000000e-01 : f32
    %32 = vector.broadcast %cst_10 : f32 to vector<16x128xf32>
    %33 = arith.mulf %32, %4 : vector<16x128xf32>
    %cst_11 = arith.constant 7.500000e-01 : f32
    %34 = vector.broadcast %cst_11 : f32 to vector<16x128xf32>
    %35 = arith.addf %34, %33 : vector<16x128xf32>
    %36 = arith.mulf %35, %31 : vector<16x128xf32>
    %c0_12 = arith.constant 0 : index
    %c0_13 = arith.constant 0 : index
    %37 = vector.load %arg5[%c0_12, %c0_13] : memref<8x128xf32, #tpu.memory_space<vmem>>, vector<8x128xf32>
    %38 = vector.shape_cast %36 : vector<16x128xf32> to vector<2x8x128xf32>
    %cst_14 = arith.constant dense<0.000000e+00> : vector<8x128xf32>
    %39 = vector.multi_reduction <add>, %38, %cst_14 [0] : vector<2x8x128xf32> to vector<8x128xf32>
    %40 = arith.addf %37, %39 : vector<8x128xf32>
    %c0_15 = arith.constant 0 : index
    %c0_16 = arith.constant 0 : index
    %41 = vector.load %arg5[%c0_15, %c0_16] : memref<8x128xf32, #tpu.memory_space<vmem>>, vector<8x128xf32>
    tpu.vector_store %arg5[%c0_15, %c0_16], %40 {strides = array<i32>} : memref<8x128xf32, #tpu.memory_space<vmem>>, vector<8x128xf32>,
    %c0_i32_17 = arith.constant 0 : i32
    %42 = arith.cmpi eq, %arg1, %c0_i32_17 : i32
    %43 = arith.extui %42 : i1 to i32
    %c0_i32_18 = arith.constant 0 : i32
    %44 = arith.cmpi ne, %43, %c0_i32_18 : i32
    scf.if %44 {
      %c0_19 = arith.constant 0 : index
      %c0_20 = arith.constant 0 : index
      %45 = vector.load %arg5[%c0_19, %c0_20] : memref<8x128xf32, #tpu.memory_space<vmem>>, vector<8x128xf32>
      %c0_21 = arith.constant 0 : index
      %c0_22 = arith.constant 0 : index
      %c0_23 = arith.constant 0 : index
      %46 = vector.load %arg4[%c0_21, %c0_22, %c0_23] : memref<1x8x128xf32, #tpu.memory_space<vmem>>, vector<1x8x128xf32>
      %47 = vector.shape_cast %46 : vector<1x8x128xf32> to vector<8x128xf32>
      %48 = vector.shape_cast %45 : vector<8x128xf32> to vector<1x8x128xf32>
      tpu.vector_store %arg4[%c0_21, %c0_22, %c0_23], %48 {strides = array<i32>} : memref<1x8x128xf32, #tpu.memory_space<vmem>>, vector<1x8x128xf32>,
    } else {
    }
    return
  }
  func.func @transform_0(%arg0: i32, %arg1: i32) -> (i32, i32) {
    %c1_i32 = arith.constant 1 : i32
    %0 = arith.muli %arg0, %c1_i32 : i32
    %1 = arith.addi %0, %arg1 : i32
    %c0_i32 = arith.constant 0 : i32
    %2 = arith.minsi %1, %c0_i32 : i32
    %c0_i32_0 = arith.constant 0 : i32
    %c0_i32_1 = arith.constant 0 : i32
    return %2, %c0_i32_0 : i32, i32
  }
  func.func @transform_1(%arg0: i32, %arg1: i32) -> (i32, i32) {
    %c1_i32 = arith.constant 1 : i32
    %0 = arith.muli %arg0, %c1_i32 : i32
    %1 = arith.addi %0, %arg1 : i32
    %c0_i32 = arith.constant 0 : i32
    %2 = arith.minsi %1, %c0_i32 : i32
    %c0_i32_0 = arith.constant 0 : i32
    %c0_i32_1 = arith.constant 0 : i32
    return %2, %c0_i32_0 : i32, i32
  }
  func.func @transform_2(%arg0: i32, %arg1: i32) -> (i32, i32, i32) {
    %c0_i32 = arith.constant 0 : i32
    %c0_i32_0 = arith.constant 0 : i32
    %c0_i32_1 = arith.constant 0 : i32
    return %arg0, %c0_i32, %c0_i32_0 : i32, i32, i32
  }
}

</mosaic_0001>

<bundles_post_ra>
// kernel: tpu_custom_call.1
= control target key start
LH: loop header
LB: loop body
LE: loop exit
PB: predicated region body
PF: predicated region fallthrough
CT: control target
= control target key end

     0   :  { %7 = vsyncpa [#allocation4], 0  ;;  %s355_s0 = inlined_call_operand.hbm [shape: f32[16,128], index: 0, kind: input, shape index: {}]   ;;  %s356_s1 = inlined_call_operand.hbm [shape: f32[16,128], index: 1, kind: input, shape index: {}]   ;;  %s357_s2 = inlined_call_operand.hbm [shape: f32[1,8,128], index: 2, kind: output, shape index: {}]  }
   0x1   :  { %8 = vsyncpa [#allocation7], 0 }
   0x2   :  { %9 = vsyncpa [#allocation5], 0  ;;  %s20_s11 = sshll.u32 %s355_s0, 4  ;;  %s289_s12 = smov [#allocation3]   ;;  %s21_s11 = int_to_ptr.hbm [resolvable:$true] %s20_s11 }
   0x3   :  { %s22_s13 = sshll.u32 %s289_s12, 4  ;;  %s39_s16 = sshll.u32 %s356_s1, 4  ;;  %s23_s13 = int_to_ptr.vmem [resolvable:$true] %s22_s13  ;;  %s40_s16 = int_to_ptr.hbm [resolvable:$true] %s39_s16 }
   0x4   :  { %s290_s17 = smov 128   ;;  %s291_s18 = smov 8  }
   0x5   :  { %28 = dma.hbm_to_vmem [thread:$0]  %s21_s11, 256, %s23_s13, [#allocation4], %s290_s17, %s290_s17, %s291_s18  }
   0x6   :  { %s292_s19 = smov [#allocation6]  }
   0x7   :  { %s41_s20 = sshll.u32 %s292_s19, 4  ;;  %s42_s20 = int_to_ptr.vmem [resolvable:$true] %s41_s20 }
   0x8   :  { %47 = dma.hbm_to_vmem [thread:$0]  %s40_s16, 256, %s42_s20, [#allocation7], %s290_s17, %s290_s17, %s291_s18  }
   0x9   :  { %283 = dma.done.wait [#allocation4], 256  }
   0xa   :  { %284 = vsyncadd [#allocation4], 4294967040 }
   0xb   :  { %285 = dma.done.wait [#allocation7], 256  }
   0xc   :  { %286 = vsyncadd [#allocation7], 4294967040  ;;  %v315_v0 = vld [vmem:[#allocation3] sm:$0xff]  ;;  %v317_v1 = vld [vmem:[#allocation3 + $0x8] sm:$0xff]  ;;  %s293_s0 = smov [#allocation8]   ;;  %s179_s23 = sshll.u32 %s357_s2, 4  ;;  %s180_s23 = int_to_ptr.hbm [resolvable:$true] %s179_s23 }
   0xd   :  { %v73_v2 = vand.u32 2147483647, %v315_v0  ;;  %v74_v3 = vand.u32 2147483647, %v317_v1  ;;  %v71_v24 = vld [vmem:[#allocation6] sm:$0xff]  ;;  %v81_v26 = vmax.f32 %v315_v0, 0.0 }
   0xe   :  { %v83_v27 = vmul.f32 %v71_v24, %v315_v0  ;;  %v72_v37 = vld [vmem:[#allocation6 + $0x8] sm:$0xff]  ;;  %v82_v41 = vmax.f32 %v317_v1, 0.0  ;;  %vm139_vm8 = vcmp.ge.f32.partialorder %v315_v0, 0.0  ;;  %vm140_vm9 = vcmp.ge.f32.partialorder %v317_v1, 0.0  ;;  %s177_s1 = sshll.u32 %s293_s0, 4  ;;  %s178_s1 = int_to_ptr.vmem [resolvable:$true] %s177_s1 }
   0xf   :  { %v75_v4 = vsub.f32 0.0, %v73_v2  ;;  %v76_v5 = vsub.f32 0.0, %v74_v3  ;;  %v84_v42 = vmul.f32 %v72_v37, %v317_v1  ;;  %v157_v3 = vmul.f32 -0.5, %v71_v24 }
  0x10   :  { %v85_v57 = vsub.f32 %v81_v26, %v83_v27 }
  0x11   :  { %v77_v6 = vmul.f32 1.442695, %v75_v4  ;;  %v79_v7 = vmul.f32 1.442695, %v76_v5  ;;  %v86_v61 = vsub.f32 %v82_v41, %v84_v42  ;;  %v158_v5 = vmul.f32 -0.5, %v72_v37 }
  0x13   :  { %199 = vpow2.f32 %v77_v6 }
  0x14   :  { %201 = vpow2.f32 %v79_v7 }
  0x19   :  { %v200_v8 = vpop.eup %199 }
  0x1a   :  { %v202_v9 = vpop.eup %201  ;;  %v87_v10 = vadd.f32 1.0, %v200_v8  ;;  %v90_v14 = vmul.f32 -0.5, %v200_v8  ;;  %v93_v38 = vand.u32 2147483647, %v200_v8 }
  0x1b   :  { %v96_v11 = vadd.f32 1.0, %v202_v9  ;;  %v99_v15 = vmul.f32 -0.5, %v202_v9  ;;  %v102_v43 = vand.u32 2147483647, %v202_v9 }
  0x1c   :  { %203 = vrcp.f32 %v87_v10  ;;  %vm114_vm0 = vweird.f32 %v87_v10  ;;  %v120_v17 = vand.u32 2147483648, %v87_v10  ;;  %v118_v20 = vand.u32 2147483647, %v87_v10 }
  0x1d   :  { %205 = vrcp.f32 %v96_v11  ;;  %v135_v21 = vand.u32 2147483648, %v96_v11  ;;  %vm129_vm2 = vweird.f32 %v96_v11  ;;  %v133_v23 = vand.u32 2147483647, %v96_v11 }
  0x1e   :  { %207 = vlog2.f32 %v87_v10  ;;  %v121_v29 = vor.u32 1.1754944e-38, %v120_v17  ;;  %v91_v32 = vadd.f32 1.0, %v90_v14  ;;  %vm119_vm5 = vcmp.eq.f32.partialorder %v118_v20, 8.507059e+37 }
  0x1f   :  { %209 = vlog2.f32 %v96_v11  ;;  %v136_v35 = vor.u32 1.1754944e-38, %v135_v21  ;;  %v100_v39 = vadd.f32 1.0, %v99_v15  ;;  %vm134_vm7 = vcmp.eq.f32.partialorder %v133_v23, 8.507059e+37 }
  0x20   :  { %v92_v48 = vmul.f32 %v200_v8, %v91_v32  ;;  %vm340_vm10 = vcmp.lt.f32.partialorder %v93_v38, 0.0004427343  ;;  %vm344_vm11 = vcmp.lt.f32.partialorder %v102_v43, 0.0004427343 }
  0x21   :  { %v101_v53 = vmul.f32 %v202_v9, %v100_v39 }
  0x22   :  { %v204_v12 = vpop.eup %203 }
  0x23   :  { %v206_v13 = vpop.eup %205  ;;  %v110_v16 = vmul.f32 %v204_v12, %v87_v10  ;;  %vm115_vm1 = vweird.f32 %v204_v12 }
  0x24   :  { %v125_v18 = vmul.f32 %v206_v13, %v96_v11  ;;  %vm130_vm3 = vweird.f32 %v206_v13  ;;  %vm324_vm4 = vmor %vm114_vm0, %vm115_vm1  ;;  %v208_v31 = vpop.eup %207  ;;  %v159_v11 = vadd.f32 0.75, %v157_v3 }
  0x25   :  { %v111_v19 = vsub.f32 1.0, %v110_v16  ;;  %vm328_vm6 = vmor %vm129_vm2, %vm130_vm3  ;;  %v210_v36 = vpop.eup %209  ;;  %v89_v47 = vmul.f32 0.6931472, %v208_v31 }
  0x26   :  { %v126_v22 = vsub.f32 1.0, %v125_v18  ;;  %v98_v52 = vmul.f32 0.6931472, %v210_v36 }
  0x27   :  { %v112_v25 = vmul.f32 %v204_v12, %v111_v19  ;;  %v95_v62 = vsel %vm340_vm10, %v92_v48, %v89_v47 }
  0x28   :  { %v127_v30 = vmul.f32 %v206_v13, %v126_v22  ;;  %v104_v1 = vsel %vm344_vm11, %v101_v53, %v98_v52  ;;  %v105_v6 = vadd.f32 %v95_v62, %v85_v57 }
  0x29   :  { %v113_v33 = vadd.f32 %v204_v12, %v112_v25 }
  0x2a   :  { %v128_v40 = vadd.f32 %v206_v13, %v127_v30 }
  0x2b   :  { %v117_v44 = vsel %vm324_vm4, %v204_v12, %v113_v33 }
  0x2c   :  { %v122_v45 = vsel %vm119_vm5, %v121_v29, %v117_v44  ;;  %v132_v46 = vsel %vm328_vm6, %v206_v13, %v128_v40  ;;  %v160_v13 = vadd.f32 0.75, %v158_v5 }
  0x2d   :  { %v137_v49 = vsel %vm134_vm7, %v136_v35, %v132_v46  ;;  %v141_v50 = vmul.f32 %v200_v8, %v122_v45  ;;  %v106_v8 = vadd.f32 %v104_v1, %v86_v61 }
  0x2e   :  { %v142_v54 = vmul.f32 %v202_v9, %v137_v49 }
  0x2f   :  { %v143_v56 = vsel %vm139_vm8, %v122_v45, %v141_v50 }
  0x30   :  { %v144_v58 = vsel %vm140_vm9, %v137_v49, %v142_v54  ;;  %v145_v59 = vadd.f32 %v143_v56, %v71_v24  ;;  %v147_v60 = vmul.f32 %v143_v56, %v71_v24 }
  0x31   :  { %v146_v63 = vadd.f32 %v144_v58, %v72_v37  ;;  %v148_v0 = vmul.f32 %v144_v58, %v72_v37 }
  0x32   :  { %v149_v2 = vmul.f32 2.0, %v147_v60 }
  0x33   :  { %v150_v4 = vmul.f32 2.0, %v148_v0 }
  0x34   :  { %v151_v7 = vsub.f32 %v145_v59, %v149_v2 }
  0x35   :  { %v152_v9 = vsub.f32 %v146_v63, %v150_v4 }
  0x36   :  { %v153_v10 = vmul.f32 %v151_v7, %v151_v7 }
  0x37   :  { %v154_v12 = vmul.f32 %v152_v9, %v152_v9 }
  0x38   :  { %v155_v14 = vmul.f32 %v153_v10, %v105_v6 }
  0x39   :  { %v156_v15 = vmul.f32 %v154_v12, %v106_v8 }
  0x3a   :  { %v161_v16 = vmul.f32 %v159_v11, %v155_v14 }
  0x3b   :  { %v162_v17 = vmul.f32 %v160_v13, %v156_v15 }
  0x3d   :  { %v164_v18 = vadd.f32 %v162_v17, %v161_v16 }
  0x3f   :  { %171 = vst [vmem:[#allocation8] sm:$0xff] %v164_v18 }
  0x40   :  { %182 = dma.vmem_to_hbm [thread:$0]  %s178_s1, 128, %s180_s23, [#allocation5]  }
  0x41   :  { %287 = dma.done.wait [#allocation5], 128  }
  0x42   :  { %288 = vsyncadd [#allocation5], 4294967168 }
  0x43   :  { %187 = vsyncpa [#allocation4], 1 }
  0x44   :  { %188 = vsyncpa [#allocation7], 1 }
  0x45   :  { %189 = vsyncpa [#allocation5], 1 }

</bundles_post_ra>
